<compile_context>
chip_gen: v7x
topology: tpu7x:2x2x1
jax: 0.10.0
libtpu: 0.0.40
codegen_flags: <defaults>
</compile_context>

<pallas_src>
import jax
import jax.numpy as jnp
from jax.experimental import pallas as pl
from jax.experimental.pallas import tpu as pltpu


def _model_embed_kernel(ids_ref, wbig_ref, bbig_ref, wh_ref, bh_ref, out_ref):
    TN, m = ids_ref.shape
    MV, WE = wbig_ref.shape          # MV = m*V, WE = w_out*E
    V = MV // m
    E = out_ref.shape[1]
    w_out = WE // E

    ids = ids_ref[...]                                     # (TN, m) int32

    # ---- one-hot built directly in (TN, m*V) lane layout ("key" trick) ----
    # column c is hot  <=>  ids[n, c // V] == c % V  <=>  key[n, c//V] == c,
    # with key[n, p] = ids[n, p] + p*V.  Only compares/adds, no relayouts.
    key = ids + V * jax.lax.broadcasted_iota(jnp.int32, (TN, m), 1)
    iota_c = jax.lax.broadcasted_iota(jnp.int32, (TN, MV), 1)
    onehot = (key[:, 0:1] == iota_c).astype(jnp.float32)
    for p in range(1, m):                                  # small static loop
        onehot = onehot + (key[:, p:p + 1] == iota_c).astype(jnp.float32)

    # ---- entire conv (embedding lookup folded in) as ONE MXU matmul ----
    # (TN, m*V) @ (m*V, w_out*E); W_big is banded with blocks etab @ wc[j].
    conv = jnp.dot(onehot, wbig_ref[...],
                   preferred_element_type=jnp.float32) + bbig_ref[...]

    # ---- ReLU + max over word positions (max with 0 replaces the ReLU) ----
    x = jnp.zeros((TN, E), jnp.float32)
    for t in range(w_out):
        x = jnp.maximum(x, conv[:, t * E:(t + 1) * E])

    # ---- Highway with fused proj/gate matmul: (TN, E) @ (E, 2E) ----
    hw = jnp.dot(x, wh_ref[...], preferred_element_type=jnp.float32) + bh_ref[...]
    x_proj = jnp.maximum(hw[:, :E], 0.0)
    x_gate = jax.nn.sigmoid(hw[:, E:])
    h = x_gate * x_proj + (1.0 - x_gate) * x

    # Dropout p=0.3: identity in eval mode.
    out_ref[...] = h


def model_embeddings_forward(ids, params, *, block_n=512):
    """ids: (L, B, m) int32 char indices -> (L, B, E) float32 word embeddings."""
    L, B, m = ids.shape
    N = L * B
    etab, wc, bc = params["etab"], params["wc"], params["bc"]
    V, C = etab.shape
    K, _, E = wc.shape
    w_out = m - K + 1
    assert w_out >= 1

    # ---- host-side precompute: fold embedding table into conv weights ----
    # wfold[j] = etab @ wc[j]  (V, E);  W_big is banded so that
    # conv[:, t*E:(t+1)*E] = sum_j onehot(pos t+j) @ wfold[j].
    wfold = jnp.einsum("vc,kce->kve", etab, wc)            # (K, V, E)
    wbig = jnp.zeros((m * V, w_out * E), jnp.float32)
    for t in range(w_out):
        for j in range(K):
            p = t + j
            wbig = wbig.at[p * V:(p + 1) * V, t * E:(t + 1) * E].set(wfold[j])
    bbig = jnp.tile(bc, (1, w_out))                        # (1, w_out*E)
    wh = jnp.concatenate([params["wp"], params["wg"]], axis=1)   # (E, 2E)
    bh = jnp.concatenate([params["bp"], params["bg"]], axis=1)   # (1, 2E)

    # ---- row tiling: large tiles, pad N instead of asserting divisibility ----
    block_n = max(8, min(block_n, ((N + 7) // 8) * 8))     # multiple of 8
    N_pad = ((N + block_n - 1) // block_n) * block_n
    ids2 = ids.reshape(N, m).astype(jnp.int32)
    if N_pad != N:
        ids2 = jnp.pad(ids2, ((0, N_pad - N), (0, 0)))     # pad rows use char 0

    out = pl.pallas_call(
        _model_embed_kernel,
        out_shape=jax.ShapeDtypeStruct((N_pad, E), jnp.float32),
        grid_spec=pltpu.PrefetchScalarGridSpec(
            num_scalar_prefetch=0,
            grid=(N_pad // block_n,),
            in_specs=[
                pl.BlockSpec((block_n, m), lambda i: (i, 0)),        # ids tile
                pl.BlockSpec((m * V, w_out * E), lambda i: (0, 0)),  # folded conv W
                pl.BlockSpec((1, w_out * E), lambda i: (0, 0)),      # conv bias (tiled)
                pl.BlockSpec((E, 2 * E), lambda i: (0, 0)),          # highway W (proj|gate)
                pl.BlockSpec((1, 2 * E), lambda i: (0, 0)),          # highway b (proj|gate)
            ],
            out_specs=pl.BlockSpec((block_n, E), lambda i: (i, 0)),
        ),
        compiler_params=pltpu.CompilerParams(
            dimension_semantics=("parallel",)),  # shards across TCs on v7x when grid >= 2
    )(ids2, wbig, bbig, wh, bh)

    return out[:N].reshape(L, B, E)


def init_params(key, *, vocab_size, e_char, embed_size, kernel_size, pad_idx):
    ks = jax.random.split(key, 7)
    etab = 0.1 * jax.random.normal(ks[0], (vocab_size, e_char), jnp.float32)
    etab = etab.at[pad_idx].set(0.0)                       # padding_idx row is zero
    # Stored pre-transposed relative to PyTorch:
    #   conv  : torch (E, C, K)  -> here (K, C, E)
    #   linear: torch (out, in)  -> here (in, out)
    wc = 0.1 * jax.random.normal(ks[1], (kernel_size, e_char, embed_size), jnp.float32)
    bc = 0.1 * jax.random.normal(ks[2], (1, embed_size), jnp.float32)
    wp = 0.1 * jax.random.normal(ks[3], (embed_size, embed_size), jnp.float32)
    bp = 0.1 * jax.random.normal(ks[4], (1, embed_size), jnp.float32)
    wg = 0.1 * jax.random.normal(ks[5], (embed_size, embed_size), jnp.float32)
    bg = 0.1 * jax.random.normal(ks[6], (1, embed_size), jnp.float32)
    return dict(etab=etab, wc=wc, bc=bc, wp=wp, bp=bp, wg=wg, bg=bg)


def reference_forward(ids, params):
    """Pure-JAX reference mirroring the PyTorch module (eval mode)."""
    L, B, m = ids.shape
    etab, wc, bc = params["etab"], params["wc"], params["bc"]
    K = wc.shape[0]
    emb = etab[ids].reshape(L * B, m, etab.shape[1])       # (N, m, C)
    w_out = m - K + 1
    taps = []
    for t in range(w_out):
        s = sum(emb[:, t + j, :] @ wc[j] for j in range(K)) + bc[0]
        taps.append(s)
    conv = jnp.stack(taps, axis=1)                         # (N, w_out, E)
    x = jnp.max(jax.nn.relu(conv), axis=1)                 # (N, E)
    x_proj = jax.nn.relu(x @ params["wp"] + params["bp"][0])
    x_gate = jax.nn.sigmoid(x @ params["wg"] + params["bg"][0])
    h = x_gate * x_proj + (1.0 - x_gate) * x
    return h.reshape(L, B, -1)


if __name__ == "__main__":
    # Small shapes consistent with the module's forward:
    # sentence_length=4, batch_size=4, max_word_length=8, embed_size=32,
    # char vocab=30, char embedding dim=50, conv kernel=5.
    L, B, m = 4, 4, 8
    V, E_CHAR, E, K = 30, 50, 32, 5
    PAD_IDX = 0

    root = jax.random.PRNGKey(0)
    kp, ki = jax.random.split(root)
    params = init_params(kp, vocab_size=V, e_char=E_CHAR,
                         embed_size=E, kernel_size=K, pad_idx=PAD_IDX)
    ids = jax.random.randint(ki, (L, B, m), 0, V, dtype=jnp.int32)

    out = model_embeddings_forward(ids, params)
    out = jax.block_until_ready(out)

    ref = reference_forward(ids, params)
    assert out.shape == (L, B, E), out.shape
    assert jnp.allclose(out, ref, atol=1e-4, rtol=1e-4), \
        float(jnp.max(jnp.abs(out - ref)))
    print("KERNEL_OK")
</pallas_src>

<mosaic_0001>
module attributes {stable_mosaic.version = 11 : i64} {
  func.func @_model_embed_kernel(%arg0: i32, %arg1: memref<16x8xi32, #tpu.memory_space<vmem>>, %arg2: memref<240x128xf32, #tpu.memory_space<vmem>>, %arg3: memref<1x128xf32, #tpu.memory_space<vmem>>, %arg4: memref<32x64xf32, #tpu.memory_space<vmem>>, %arg5: memref<1x64xf32, #tpu.memory_space<vmem>>, %arg6: memref<16x32xf32, #tpu.memory_space<vmem>>) attributes {dimension_semantics = [#tpu.dimension_semantics<parallel>], iteration_bounds = array<i64: 1>, scalar_prefetch = 0 : i64, scratch_operands = 0 : i64, tpu.core_type = #tpu.core_type<tc>, window_params = [{transform_indices = @transform_0, window_bounds = array<i64: 16, 8>}, {pipeline_mode = #tpu.pipeline_mode<synchronous>, transform_indices = @transform_1, window_bounds = array<i64: 240, 128>}, {pipeline_mode = #tpu.pipeline_mode<synchronous>, transform_indices = @transform_2, window_bounds = array<i64: 1, 128>}, {pipeline_mode = #tpu.pipeline_mode<synchronous>, transform_indices = @transform_3, window_bounds = array<i64: 32, 64>}, {pipeline_mode = #tpu.pipeline_mode<synchronous>, transform_indices = @transform_4, window_bounds = array<i64: 1, 64>}, {transform_indices = @transform_5, window_bounds = array<i64: 16, 32>}]} {
    %c0 = arith.constant 0 : index
    %c0_0 = arith.constant 0 : index
    %0 = vector.load %arg1[%c0, %c0_0] : memref<16x8xi32, #tpu.memory_space<vmem>>, vector<16x8xi32>
    %1 = tpu.iota {dimensions = array<i32: 1>} : vector<16x8xi32>
    %c30_i32 = arith.constant 30 : i32
    %2 = vector.broadcast %c30_i32 : i32 to vector<16x8xi32>
    %3 = arith.muli %2, %1 : vector<16x8xi32>
    %4 = arith.addi %0, %3 : vector<16x8xi32>
    %5 = tpu.iota {dimensions = array<i32: 1>} : vector<16x240xi32>
    %6 = vector.extract_strided_slice %4 {offsets = [0, 0], sizes = [16, 1], strides = [1, 1]} : vector<16x8xi32> to vector<16x1xi32>
    %7 = vector.broadcast %6 : vector<16x1xi32> to vector<16x240xi32>
    %8 = arith.cmpi eq, %7, %5 : vector<16x240xi32>
    %9 = arith.extui %8 : vector<16x240xi1> to vector<16x240xi32>
    %10 = arith.sitofp %9 : vector<16x240xi32> to vector<16x240xf32>
    %11 = vector.extract_strided_slice %4 {offsets = [0, 1], sizes = [16, 1], strides = [1, 1]} : vector<16x8xi32> to vector<16x1xi32>
    %12 = vector.broadcast %11 : vector<16x1xi32> to vector<16x240xi32>
    %13 = arith.cmpi eq, %12, %5 : vector<16x240xi32>
    %14 = arith.extui %13 : vector<16x240xi1> to vector<16x240xi32>
    %15 = arith.sitofp %14 : vector<16x240xi32> to vector<16x240xf32>
    %16 = arith.addf %10, %15 : vector<16x240xf32>
    %17 = vector.extract_strided_slice %4 {offsets = [0, 2], sizes = [16, 1], strides = [1, 1]} : vector<16x8xi32> to vector<16x1xi32>
    %18 = vector.broadcast %17 : vector<16x1xi32> to vector<16x240xi32>
    %19 = arith.cmpi eq, %18, %5 : vector<16x240xi32>
    %20 = arith.extui %19 : vector<16x240xi1> to vector<16x240xi32>
    %21 = arith.sitofp %20 : vector<16x240xi32> to vector<16x240xf32>
    %22 = arith.addf %16, %21 : vector<16x240xf32>
    %23 = vector.extract_strided_slice %4 {offsets = [0, 3], sizes = [16, 1], strides = [1, 1]} : vector<16x8xi32> to vector<16x1xi32>
    %24 = vector.broadcast %23 : vector<16x1xi32> to vector<16x240xi32>
    %25 = arith.cmpi eq, %24, %5 : vector<16x240xi32>
    %26 = arith.extui %25 : vector<16x240xi1> to vector<16x240xi32>
    %27 = arith.sitofp %26 : vector<16x240xi32> to vector<16x240xf32>
    %28 = arith.addf %22, %27 : vector<16x240xf32>
    %29 = vector.extract_strided_slice %4 {offsets = [0, 4], sizes = [16, 1], strides = [1, 1]} : vector<16x8xi32> to vector<16x1xi32>
    %30 = vector.broadcast %29 : vector<16x1xi32> to vector<16x240xi32>
    %31 = arith.cmpi eq, %30, %5 : vector<16x240xi32>
    %32 = arith.extui %31 : vector<16x240xi1> to vector<16x240xi32>
    %33 = arith.sitofp %32 : vector<16x240xi32> to vector<16x240xf32>
    %34 = arith.addf %28, %33 : vector<16x240xf32>
    %35 = vector.extract_strided_slice %4 {offsets = [0, 5], sizes = [16, 1], strides = [1, 1]} : vector<16x8xi32> to vector<16x1xi32>
    %36 = vector.broadcast %35 : vector<16x1xi32> to vector<16x240xi32>
    %37 = arith.cmpi eq, %36, %5 : vector<16x240xi32>
    %38 = arith.extui %37 : vector<16x240xi1> to vector<16x240xi32>
    %39 = arith.sitofp %38 : vector<16x240xi32> to vector<16x240xf32>
    %40 = arith.addf %34, %39 : vector<16x240xf32>
    %41 = vector.extract_strided_slice %4 {offsets = [0, 6], sizes = [16, 1], strides = [1, 1]} : vector<16x8xi32> to vector<16x1xi32>
    %42 = vector.broadcast %41 : vector<16x1xi32> to vector<16x240xi32>
    %43 = arith.cmpi eq, %42, %5 : vector<16x240xi32>
    %44 = arith.extui %43 : vector<16x240xi1> to vector<16x240xi32>
    %45 = arith.sitofp %44 : vector<16x240xi32> to vector<16x240xf32>
    %46 = arith.addf %40, %45 : vector<16x240xf32>
    %47 = vector.extract_strided_slice %4 {offsets = [0, 7], sizes = [16, 1], strides = [1, 1]} : vector<16x8xi32> to vector<16x1xi32>
    %48 = vector.broadcast %47 : vector<16x1xi32> to vector<16x240xi32>
    %49 = arith.cmpi eq, %48, %5 : vector<16x240xi32>
    %50 = arith.extui %49 : vector<16x240xi1> to vector<16x240xi32>
    %51 = arith.sitofp %50 : vector<16x240xi32> to vector<16x240xf32>
    %52 = arith.addf %46, %51 : vector<16x240xf32>
    %c0_1 = arith.constant 0 : index
    %c0_2 = arith.constant 0 : index
    %53 = vector.load %arg2[%c0_1, %c0_2] : memref<240x128xf32, #tpu.memory_space<vmem>>, vector<240x128xf32>
    %cst = arith.constant dense<0.000000e+00> : vector<16x128xf32>
    %54 = tpu.matmul %52, %53, %cst {dimension_numbers = #tpu.dot_dimension_numbers<[1], [0], [0], [1], [0, 0, 1, 1], [], []>} : vector<16x240xf32>, vector<240x128xf32>, vector<16x128xf32> -> vector<16x128xf32>
    %c0_3 = arith.constant 0 : index
    %c0_4 = arith.constant 0 : index
    %55 = vector.load %arg3[%c0_3, %c0_4] : memref<1x128xf32, #tpu.memory_space<vmem>>, vector<1x128xf32>
    %56 = vector.broadcast %55 : vector<1x128xf32> to vector<16x128xf32>
    %57 = arith.addf %54, %56 : vector<16x128xf32>
    %cst_5 = arith.constant 0.000000e+00 : f32
    %58 = vector.broadcast %cst_5 : f32 to vector<16x32xf32>
    %59 = vector.extract_strided_slice %57 {offsets = [0, 0], sizes = [16, 32], strides = [1, 1]} : vector<16x128xf32> to vector<16x32xf32>
    %60 = arith.maximumf %58, %59 : vector<16x32xf32>
    %61 = vector.extract_strided_slice %57 {offsets = [0, 32], sizes = [16, 32], strides = [1, 1]} : vector<16x128xf32> to vector<16x32xf32>
    %62 = arith.maximumf %60, %61 : vector<16x32xf32>
    %63 = vector.extract_strided_slice %57 {offsets = [0, 64], sizes = [16, 32], strides = [1, 1]} : vector<16x128xf32> to vector<16x32xf32>
    %64 = arith.maximumf %62, %63 : vector<16x32xf32>
    %65 = vector.extract_strided_slice %57 {offsets = [0, 96], sizes = [16, 32], strides = [1, 1]} : vector<16x128xf32> to vector<16x32xf32>
    %66 = arith.maximumf %64, %65 : vector<16x32xf32>
    %c0_6 = arith.constant 0 : index
    %c0_7 = arith.constant 0 : index
    %67 = vector.load %arg4[%c0_6, %c0_7] : memref<32x64xf32, #tpu.memory_space<vmem>>, vector<32x64xf32>
    %cst_8 = arith.constant dense<0.000000e+00> : vector<16x64xf32>
    %68 = tpu.matmul %66, %67, %cst_8 {dimension_numbers = #tpu.dot_dimension_numbers<[1], [0], [0], [1], [0, 0, 1, 1], [], []>} : vector<16x32xf32>, vector<32x64xf32>, vector<16x64xf32> -> vector<16x64xf32>
    %c0_9 = arith.constant 0 : index
    %c0_10 = arith.constant 0 : index
    %69 = vector.load %arg5[%c0_9, %c0_10] : memref<1x64xf32, #tpu.memory_space<vmem>>, vector<1x64xf32>
    %70 = vector.broadcast %69 : vector<1x64xf32> to vector<16x64xf32>
    %71 = arith.addf %68, %70 : vector<16x64xf32>
    %72 = vector.extract_strided_slice %71 {offsets = [0, 0], sizes = [16, 32], strides = [1, 1]} : vector<16x64xf32> to vector<16x32xf32>
    %cst_11 = arith.constant 0.000000e+00 : f32
    %73 = vector.broadcast %cst_11 : f32 to vector<16x32xf32>
    %74 = arith.maximumf %72, %73 : vector<16x32xf32>
    %75 = vector.extract_strided_slice %71 {offsets = [0, 32], sizes = [16, 32], strides = [1, 1]} : vector<16x64xf32> to vector<16x32xf32>
    %76 = arith.negf %75 : vector<16x32xf32>
    %77 = math.exp %76 : vector<16x32xf32>
    %cst_12 = arith.constant 1.000000e+00 : f32
    %78 = vector.broadcast %cst_12 : f32 to vector<16x32xf32>
    %79 = arith.addf %78, %77 : vector<16x32xf32>
    %80 = arith.divf %78, %79 : vector<16x32xf32>
    %81 = arith.mulf %80, %74 : vector<16x32xf32>
    %cst_13 = arith.constant 1.000000e+00 : f32
    %82 = vector.broadcast %cst_13 : f32 to vector<16x32xf32>
    %83 = arith.subf %82, %80 : vector<16x32xf32>
    %84 = arith.mulf %83, %66 : vector<16x32xf32>
    %85 = arith.addf %81, %84 : vector<16x32xf32>
    %c0_14 = arith.constant 0 : index
    %c0_15 = arith.constant 0 : index
    %86 = vector.load %arg6[%c0_14, %c0_15] : memref<16x32xf32, #tpu.memory_space<vmem>>, vector<16x32xf32>
    tpu.vector_store %arg6[%c0_14, %c0_15], %85 {strides = array<i32>} : memref<16x32xf32, #tpu.memory_space<vmem>>, vector<16x32xf32>,
    return
  }
  func.func @transform_0(%arg0: i32) -> (i32, i32) {
    %c0_i32 = arith.constant 0 : i32
    %c0_i32_0 = arith.constant 0 : i32
    return %arg0, %c0_i32 : i32, i32
  }
  func.func @transform_1(%arg0: i32) -> (i32, i32) {
    %c0_i32 = arith.constant 0 : i32
    %c0_i32_0 = arith.constant 0 : i32
    %c0_i32_1 = arith.constant 0 : i32
    return %c0_i32, %c0_i32_0 : i32, i32
  }
  func.func @transform_2(%arg0: i32) -> (i32, i32) {
    %c0_i32 = arith.constant 0 : i32
    %c0_i32_0 = arith.constant 0 : i32
    %c0_i32_1 = arith.constant 0 : i32
    return %c0_i32, %c0_i32_0 : i32, i32
  }
  func.func @transform_3(%arg0: i32) -> (i32, i32) {
    %c0_i32 = arith.constant 0 : i32
    %c0_i32_0 = arith.constant 0 : i32
    %c0_i32_1 = arith.constant 0 : i32
    return %c0_i32, %c0_i32_0 : i32, i32
  }
  func.func @transform_4(%arg0: i32) -> (i32, i32) {
    %c0_i32 = arith.constant 0 : i32
    %c0_i32_0 = arith.constant 0 : i32
    %c0_i32_1 = arith.constant 0 : i32
    return %c0_i32, %c0_i32_0 : i32, i32
  }
  func.func @transform_5(%arg0: i32) -> (i32, i32) {
    %c0_i32 = arith.constant 0 : i32
    %c0_i32_0 = arith.constant 0 : i32
    return %arg0, %c0_i32 : i32, i32
  }
}

</mosaic_0001>

<bundles_post_ra>
// kernel: tpu_custom_call.1
= control target key start
LH: loop header
LB: loop body
LE: loop exit
PB: predicated region body
PF: predicated region fallthrough
CT: control target
= control target key end

     0   :  { %10 = vsyncpa [#allocation3], 0  ;;  %s948_s0 = inlined_call_operand.vmem [shape: s32[16,8], index: 0, kind: input, shape index: {}]   ;;  %s949_s1 = inlined_call_operand.hbm [shape: f32[240,128], index: 1, kind: input, shape index: {}]   ;;  %s950_s2 = inlined_call_operand.vmem [shape: f32[1,128], index: 2, kind: input, shape index: {}]   ;;  %s951_s3 = inlined_call_operand.vmem [shape: f32[32,64], index: 3, kind: input, shape index: {}]   ;;  %s952_s4 = inlined_call_operand.vmem [shape: f32[1,64], index: 4, kind: input, shape index: {}]   ;;  %s953_s5 = inlined_call_operand.hbm [shape: f32[16,32], index: 5, kind: output, shape index: {}]  }
   0x1   :  { %11 = vsyncpa [#allocation4], 0  ;;  %s716_s18 = smov [#allocation2]   ;;  %s668_s22 = scalar_lea.hbm %s949_s1, 3840 }
   0x2   :  { %s19_s19 = sshll.u32 %s716_s18, 4  ;;  %p669_p0 = scmp.ne.s32.totalorder %s949_s1, %s668_s22  ;;  %s20_s19 = int_to_ptr.vmem [resolvable:$true] %s19_s19 }
   0x3   :  { %p672_p1 = scmp.lt.u32.totalorder %s668_s22, %s949_s1 }
   0x5   :  { %p674_p2 = pnand %p672_p1, %p669_p0 }
   0x7   :  { %677 = shalt.err (!%p674_p2)
}
   0x8   :  { %s678_s27 = scalar_lea.vmem %s20_s19, 3840  ;;  %p683_p4 = scmp.lt.s32.totalorder %s20_s19, %s20_s19 }
   0x9   :  { %p679_p3 = scmp.ne.s32.totalorder %s20_s19, %s678_s27  ;;  %p684_p5 = scmp.lt.s32.totalorder %s678_s27, %s678_s27 }
   0xb   :  { %p685_p6 = por %p684_p5, %p683_p4 }
   0xd   :  { %p686_p7 = pnand %p685_p6, %p679_p3 }
   0xf   :  { %689 = shalt.err (!%p686_p7)
}
  0x10   :  { %s717_s28 = smov 128   ;;  %s718_s29 = smov 8  }
  0x11   :  { %25 = dma.hbm_to_vmem [thread:$0]  %s949_s1, 3840, %s20_s19, [#allocation3], %s717_s28, %s717_s28, %s718_s29  }
  0x12   :  { %712 = dma.done.wait [#allocation3], 3840  }
  0x13   :  { %713 = vsyncadd [#allocation3], 4294963456  ;;  %v37_v0 = vlaneseq  ;;  %v719_v1 = vmov 2   ;;  %v720_v2 = vmov 0   ;;  %v721_v4 = vmov 0.0|0.0   ;;  %v35_v6 = vld [vmem:[%s948_s0] sm:$0xff] }
  0x14   :  { %647 = vset.pattern.permute.xlu1 %v719_v1  ;;  %645 = vset.pattern.permute.xlu0 %v720_v2  ;;  %v215_v7 = vld [vmem:[#allocation2] sm:$0xff]  ;;  %v36_v9 = vld [vmem:[%s948_s0 + $0x8] sm:$0xff]  ;;  %v217_v12 = vld [vmem:[#allocation2 + $0x10] sm:$0xff]  ;;  %v722_v16 = vmov 1   ;;  %v723_v22 = vmov 3   ;;  %v724_v27 = vmov 4  }
  0x15   :  { %v778_v3 = vand.u32 127, %v37_v0  ;;  %575 = vmatprep.subr.bf16.mxu0 %v721_v4  ;;  %v216_v10 = vld [vmem:[#allocation2 + $0x8] sm:$0xff]  ;;  %v218_v13 = vld [vmem:[#allocation2 + $0x18] sm:$0xff]  ;;  %v219_v17 = vld [vmem:[#allocation2 + $0x20] sm:$0xff]  ;;  %v725_v33 = vmov 7   ;;  %v726_v34 = vmov 5  }
  0x16   :  { %v576_v11 = vpack.c.bf16 %v216_v10, %v215_v7  ;;  %v579_v15 = vpack.c.bf16 %v218_v13, %v217_v12  ;;  %v220_v18 = vld [vmem:[#allocation2 + $0x28] sm:$0xff]  ;;  %v221_v20 = vld [vmem:[#allocation2 + $0x30] sm:$0xff]  ;;  %v222_v21 = vld [vmem:[#allocation2 + $0x38] sm:$0xff]  ;;  %v727_v38 = vmov 6   ;;  %s729_s15 = smov 96   ;;  %s730_s19 = smov 64  }
  0x17   :  { %v39_v5 = vmul.u32 30, %v778_v3  ;;  %v582_v19 = vpack.c.bf16 %v220_v18, %v219_v17  ;;  %v585_v23 = vpack.c.bf16 %v222_v21, %v221_v20  ;;  %v223_v24 = vld [vmem:[#allocation2 + $0x40] sm:$0xff]  ;;  %v224_v25 = vld [vmem:[#allocation2 + $0x48] sm:$0xff]  ;;  %v225_v28 = vld [vmem:[#allocation2 + $0x50] sm:$0xff]  ;;  %s731_s20 = smov 32  }
  0x18   :  { %577 = vmatpush1.bf16.msra.mxu0 %v576_v11  ;;  %v588_v26 = vpack.c.bf16 %v224_v25, %v223_v24  ;;  %v226_v29 = vld [vmem:[#allocation2 + $0x58] sm:$0xff]  ;;  %v227_v31 = vld [vmem:[#allocation2 + $0x60] sm:$0xff]  ;;  %v228_v32 = vld [vmem:[#allocation2 + $0x68] sm:$0xff] }
  0x19   :  { %v785_v8 = vadd.s32 %v39_v5, %v35_v6  ;;  %v792_v14 = vadd.s32 %v39_v5, %v36_v9  ;;  %578 = vmatprep.subr.bf16.mxu0 %v721_v4  ;;  %v591_v30 = vpack.c.bf16 %v226_v29, %v225_v28  ;;  %v594_v35 = vpack.c.bf16 %v228_v32, %v227_v31  ;;  %v229_v36 = vld [vmem:[#allocation2 + $0x70] sm:$0xff]  ;;  %v230_v37 = vld [vmem:[#allocation2 + $0x78] sm:$0xff]  ;;  %v231_v40 = vld [vmem:[#allocation2 + $0x80] sm:$0xff] }
  0x1a   :  { %v597_v39 = vpack.c.bf16 %v230_v37, %v229_v36  ;;  %v232_v41 = vld [vmem:[#allocation2 + $0x88] sm:$0xff]  ;;  %v233_v43 = vld [vmem:[#allocation2 + $0x90] sm:$0xff]  ;;  %v234_v44 = vld [vmem:[#allocation2 + $0x98] sm:$0xff]  ;;  %v823_v5 = vadd.s32 128, %v778_v3 }
  0x1b   :  { %84 = vperm.xlu1 %647, %v785_v8   ;;  %44 = vperm.xlu0 %645, %v785_v8   ;;  %v600_v42 = vpack.c.bf16 %v232_v41, %v231_v40  ;;  %v603_v45 = vpack.c.bf16 %v234_v44, %v233_v43  ;;  %v235_v46 = vld [vmem:[#allocation2 + $0xa0] sm:$0xff]  ;;  %v236_v47 = vld [vmem:[#allocation2 + $0xa8] sm:$0xff]  ;;  %v237_v49 = vld [vmem:[#allocation2 + $0xb0] sm:$0xff] }
  0x1c   :  { %580 = vmatpush1.bf16.msra.mxu0 %v579_v15  ;;  %v606_v48 = vpack.c.bf16 %v236_v47, %v235_v46  ;;  %v238_v50 = vld [vmem:[#allocation2 + $0xb8] sm:$0xff]  ;;  %v239_v52 = vld [vmem:[#allocation2 + $0xc0] sm:$0xff]  ;;  %v240_v53 = vld [vmem:[#allocation2 + $0xc8] sm:$0xff] }
  0x1d   :  { %581 = vmatprep.subr.bf16.mxu0 %v721_v4  ;;  %v609_v51 = vpack.c.bf16 %v238_v50, %v237_v49  ;;  %v612_v54 = vpack.c.bf16 %v240_v53, %v239_v52  ;;  %v241_v55 = vld [vmem:[#allocation2 + $0xd0] sm:$0xff]  ;;  %v242_v56 = vld [vmem:[#allocation2 + $0xd8] sm:$0xff]  ;;  %v243_v58 = vld [vmem:[#allocation2 + $0xe0] sm:$0xff] }
  0x1e   :  { %v615_v57 = vpack.c.bf16 %v242_v56, %v241_v55  ;;  %v244_v59 = vld [vmem:[#allocation2 + $0xe8] sm:$0xff] }
  0x1f   :  { %648 = vset.pattern.permute.xlu1 %v720_v2  ;;  %646 = vset.pattern.permute.xlu0 %v722_v16  ;;  %v618_v60 = vpack.c.bf16 %v244_v59, %v243_v58 }
  0x20   :  { %47 = vperm.xlu1 %648, %v792_v14   ;;  %62 = vperm.xlu0 %646, %v785_v8  }
  0x21   :  { %583 = vmatpush1.bf16.msra.mxu0 %v582_v19 }
  0x22   :  { %584 = vmatprep.subr.bf16.mxu0 %v721_v4 }
  0x24   :  { %649 = vset.pattern.permute.xlu1 %v722_v16  ;;  %650 = vset.pattern.permute.xlu0 %v723_v22 }
  0x25   :  { %65 = vperm.xlu1 %649, %v792_v14   ;;  %106 = vperm.xlu0 %650, %v785_v8  }
  0x26   :  { %586 = vmatpush1.bf16.msra.mxu0 %v585_v23 }
  0x27   :  { %587 = vmatprep.subr.bf16.mxu0 %v721_v4 }
  0x29   :  { %651 = vset.pattern.permute.xlu1 %v719_v1  ;;  %109 = vperm.xlu0 %650, %v792_v14  }
  0x2a   :  { %87 = vperm.xlu1 %651, %v792_v14   ;;  %589 = vmatpush1.bf16.msra.mxu0 %v588_v26 }
  0x2b   :  { %590 = vmatprep.subr.bf16.mxu0 %v721_v4 }
  0x2d   :  { %654 = vset.pattern.permute.xlu0 %v724_v27 }
  0x2e   :  { %652 = vset.pattern.permute.xlu1 %v724_v27  ;;  %131 = vperm.xlu0 %654, %v792_v14  }
  0x2f   :  { %128 = vperm.xlu1 %652, %v785_v8   ;;  %592 = vmatpush1.bf16.msra.mxu0 %v591_v30 }
  0x30   :  { %593 = vmatprep.subr.bf16.mxu0 %v721_v4 }
  0x32   :  { %657 = vset.pattern.permute.xlu0 %v725_v33 }
  0x33   :  { %653 = vset.pattern.permute.xlu1 %v726_v34  ;;  %194 = vperm.xlu0 %657, %v785_v8  }
  0x34   :  { %150 = vperm.xlu1 %653, %v785_v8   ;;  %595 = vmatpush1.bf16.msra.mxu0 %v594_v35 }
  0x35   :  { %596 = vmatprep.subr.bf16.mxu0 %v721_v4 }
  0x38   :  { %655 = vset.pattern.permute.xlu1 %v727_v38  ;;  %598 = vmatpush1.bf16.msra.mxu0 %v597_v39 }
  0x39   :  { %172 = vperm.xlu1 %655, %v785_v8   ;;  %599 = vmatprep.subr.bf16.mxu0 %v721_v4 }
  0x3c   :  { %601 = vmatpush1.bf16.msra.mxu0 %v600_v42 }
  0x3d   :  { %656 = vset.pattern.permute.xlu1 %v726_v34  ;;  %602 = vmatprep.subr.bf16.mxu0 %v721_v4 }
  0x3e   :  { %153 = vperm.xlu1 %656, %v792_v14  }
  0x40   :  { %604 = vmatpush1.bf16.msra.mxu0 %v603_v45 }
  0x41   :  { %605 = vmatprep.subr.bf16.mxu0 %v721_v4 }
  0x42   :  { %658 = vset.pattern.permute.xlu1 %v727_v38 }
  0x43   :  { %175 = vperm.xlu1 %658, %v792_v14  }
  0x44   :  { %607 = vmatpush1.bf16.msra.mxu0 %v606_v48 }
  0x45   :  { %608 = vmatprep.subr.bf16.mxu0 %v721_v4 }
  0x47   :  { %659 = vset.pattern.permute.xlu1 %v725_v33 }
  0x48   :  { %197 = vperm.xlu1 %659, %v792_v14   ;;  %610 = vmatpush1.bf16.msra.mxu0 %v609_v51 }
  0x49   :  { %611 = vmatprep.subr.bf16.mxu0 %v721_v4 }
  0x4c   :  { %613 = vmatpush1.bf16.msra.mxu0 %v612_v54 }
  0x4d   :  { %614 = vmatprep.subr.bf16.mxu0 %v721_v4 }
  0x50   :  { %616 = vmatpush1.bf16.msra.mxu0 %v615_v57 }
  0x51   :  { %617 = vmatprep.subr.bf16.mxu0 %v721_v4  ;;  %v728_v4 = vmov 0.0  }
  0x54   :  { %619 = vmatpush1.bf16.msra.mxu0 %v618_v60 }
  0x9a   :  { %v85_v61 = vpop.permute.xlu1 %84  ;;  %v45_v62 = vpop.permute.xlu0 %44 }
  0x9b   :  { %vm49_vm0 = vcmp.eq.s32.totalorder %v45_v62, %v778_v3  ;;  %vm50_vm1 = vcmp.eq.s32.totalorder %v45_v62, %v823_v5  ;;  %vm89_vm4 = vcmp.eq.s32.totalorder %v85_v61, %v778_v3  ;;  %vm90_vm5 = vcmp.eq.s32.totalorder %v85_v61, %v823_v5 }
  0x9c   :  { %v518_v7 = vsel %vm49_vm0, 1.0, %v728_v4  ;;  %v519_v8 = vsel %vm50_vm1, 1.0, %v728_v4  ;;  %v526_v15 = vsel %vm89_vm4, 1.0, %v728_v4  ;;  %v527_v16 = vsel %vm90_vm5, 1.0, %v728_v4 }
  0x9f   :  { %v48_v63 = vpop.permute.xlu1 %47  ;;  %v63_v0 = vpop.permute.xlu0 %62 }
  0xa0   :  { %vm67_vm2 = vcmp.eq.s32.totalorder %v63_v0, %v778_v3  ;;  %vm68_vm3 = vcmp.eq.s32.totalorder %v63_v0, %v823_v5  ;;  %vm51_vm8 = vcmp.eq.s32.totalorder %v48_v63, %v778_v3  ;;  %vm52_vm9 = vcmp.eq.s32.totalorder %v48_v63, %v823_v5 }
  0xa1   :  { %v522_v9 = vsel %vm67_vm2, 1.0, %v728_v4  ;;  %v523_v10 = vsel %vm68_vm3, 1.0, %v728_v4  ;;  %v520_v22 = vsel %vm51_vm8, 1.0, %v728_v4  ;;  %v521_v23 = vsel %vm52_vm9, 1.0, %v728_v4 }
  0xa2   :  { %v79_v12 = vadd.f32 %v522_v9, %v518_v7  ;;  %v80_v13 = vadd.f32 %v523_v10, %v519_v8  ;;  %vm252_vm8 = vcmask 916480  }
  0xa4   :  { %v66_v1 = vpop.permute.xlu1 %65  ;;  %v107_v2 = vpop.permute.xlu0 %106  ;;  %v101_v18 = vadd.f32 %v526_v15, %v79_v12  ;;  %v102_v19 = vadd.f32 %v527_v16, %v80_v13  ;;  %v550_v15 = vld [vmem:[%s950_s2] ss:$0 sm:$0xff] }
  0xa5   :  { %vm111_vm6 = vcmp.eq.s32.totalorder %v107_v2, %v778_v3  ;;  %vm112_vm7 = vcmp.eq.s32.totalorder %v107_v2, %v823_v5  ;;  %vm69_vm10 = vcmp.eq.s32.totalorder %v66_v1, %v778_v3  ;;  %vm70_vm11 = vcmp.eq.s32.totalorder %v66_v1, %v823_v5 }
  0xa6   :  { %v530_v20 = vsel %vm111_vm6, 1.0, %v728_v4  ;;  %v531_v21 = vsel %vm112_vm7, 1.0, %v728_v4  ;;  %v524_v24 = vsel %vm69_vm10, 1.0, %v728_v4  ;;  %v525_v25 = vsel %vm70_vm11, 1.0, %v728_v4 }
  0xa7   :  { %v123_v30 = vadd.f32 %v530_v20, %v101_v18  ;;  %v124_v31 = vadd.f32 %v531_v21, %v102_v19  ;;  %v81_v32 = vadd.f32 %v524_v24, %v520_v22  ;;  %v82_v33 = vadd.f32 %v525_v25, %v521_v23  ;;  %v364_v19 = vld [vmem:[%s951_s3 + $0x10] sm:$0xff]  ;;  %v365_v20 = vld [vmem:[%s951_s3 + $0x18] sm:$0xff] }
  0xa8   :  { %v833_v11 = vpop.permute.xlu0 %109  ;;  %v624_v21 = vpack.c.bf16 %v365_v20, %v364_v19 }
  0xa9   :  { %v88_v6 = vpop.permute.xlu1 %87  ;;  %vm113_vm4 = vcmp.eq.s32.totalorder %v833_v11, %v778_v3  ;;  %vm114_vm5 = vcmp.eq.s32.totalorder %v833_v11, %v823_v5 }
  0xaa   :  { %vm91_vm0 = vcmp.eq.s32.totalorder %v88_v6, %v778_v3  ;;  %vm92_vm1 = vcmp.eq.s32.totalorder %v88_v6, %v823_v5  ;;  %v532_v51 = vsel %vm113_vm4, 1.0, %v728_v4  ;;  %v533_v52 = vsel %vm114_vm5, 1.0, %v728_v4 }
  0xab   :  { %v528_v38 = vsel %vm91_vm0, 1.0, %v728_v4  ;;  %v529_v39 = vsel %vm92_vm1, 1.0, %v728_v4  ;;  %vm373_vm1 = vcmask 261120  }
  0xac   :  { %v103_v49 = vadd.f32 %v528_v38, %v81_v32  ;;  %v104_v50 = vadd.f32 %v529_v39, %v82_v33  ;;  %v553_v39 = vld [vmem:[%s952_s4] ss:$0 sm:$0xff]  ;;  %s732_s4 = smov [#allocation5]  }
  0xad   :  { %v132_v17 = vpop.permute.xlu0 %131  ;;  %s506_s22 = sshll.u32 %s732_s4, 4  ;;  %s507_s22 = int_to_ptr.vmem [resolvable:$true] %s506_s22 }
  0xae   :  { %v129_v14 = vpop.permute.xlu1 %128  ;;  %vm135_vm9 = vcmp.eq.s32.totalorder %v132_v17, %v778_v3  ;;  %vm136_vm10 = vcmp.eq.s32.totalorder %v132_v17, %v823_v5  ;;  %v125_v56 = vadd.f32 %v532_v51, %v103_v49  ;;  %v126_v57 = vadd.f32 %v533_v52, %v104_v50  ;;  %s690_s23 = scalar_lea.vmem %s507_s22, 256  ;;  %p695_p9 = scmp.lt.s32.totalorder %s507_s22, %s507_s22 }
  0xaf   :  { %vm133_vm12 = vcmp.eq.s32.totalorder %v129_v14, %v778_v3  ;;  %vm134_vm13 = vcmp.eq.s32.totalorder %v129_v14, %v823_v5  ;;  %v536_v58 = vsel %vm135_vm9, 1.0, %v728_v4  ;;  %v537_v59 = vsel %vm136_vm10, 1.0, %v728_v4  ;;  %p691_p8 = scmp.ne.s32.totalorder %s507_s22, %s690_s23  ;;  %p696_p10 = scmp.lt.s32.totalorder %s690_s23, %s690_s23 }
  0xb0   :  { %v534_v27 = vsel %vm133_vm12, 1.0, %v728_v4  ;;  %v535_v28 = vsel %vm134_vm13, 1.0, %v728_v4  ;;  %v147_v63 = vadd.f32 %v536_v58, %v125_v56  ;;  %v148_v0 = vadd.f32 %v537_v59, %v126_v57 }
  0xb1   :  { %v145_v36 = vadd.f32 %v534_v27, %v123_v30  ;;  %v146_v37 = vadd.f32 %v535_v28, %v124_v31  ;;  %p697_p11 = por %p696_p10, %p695_p9 }
  0xb2   :  { %v195_v29 = vpop.permute.xlu0 %194 }
  0xb3   :  { %v151_v26 = vpop.permute.xlu1 %150  ;;  %vm199_vm2 = vcmp.eq.s32.totalorder %v195_v29, %v778_v3  ;;  %vm200_vm3 = vcmp.eq.s32.totalorder %v195_v29, %v823_v5  ;;  %p698_p12 = pnand %p697_p11, %p691_p8 }
  0xb4   :  { %vm155_vm14 = vcmp.eq.s32.totalorder %v151_v26, %v778_v3  ;;  %vm156_vm15 = vcmp.eq.s32.totalorder %v151_v26, %v823_v5  ;;  %v546_v45 = vsel %vm199_vm2, 1.0, %v728_v4  ;;  %v547_v46 = vsel %vm200_vm3, 1.0, %v728_v4 }
  0xb5   :  { %v538_v34 = vsel %vm155_vm14, 1.0, %v728_v4  ;;  %v539_v35 = vsel %vm156_vm15, 1.0, %v728_v4 }
  0xb6   :  { %v167_v41 = vadd.f32 %v538_v34, %v145_v36  ;;  %v168_v42 = vadd.f32 %v539_v35, %v146_v37 }
  0xb8   :  { %v173_v40 = vpop.permute.xlu1 %172 }
  0xb9   :  { %vm177_vm6 = vcmp.eq.s32.totalorder %v173_v40, %v778_v3  ;;  %vm178_vm7 = vcmp.eq.s32.totalorder %v173_v40, %v823_v5 }
  0xba   :  { %v542_v43 = vsel %vm177_vm6, 1.0, %v728_v4  ;;  %v543_v44 = vsel %vm178_vm7, 1.0, %v728_v4 }
  0xbb   :  { %v189_v47 = vadd.f32 %v542_v43, %v167_v41  ;;  %v190_v48 = vadd.f32 %v543_v44, %v168_v42 }
  0xbd   :  { %v211_v53 = vadd.f32 %v546_v45, %v189_v47  ;;  %v154_v54 = vpop.permute.xlu1 %153  ;;  %v212_v55 = vadd.f32 %v547_v46, %v190_v48 }
  0xbe   :  { %vm157_vm11 = vcmp.eq.s32.totalorder %v154_v54, %v778_v3  ;;  %vm158_vm12 = vcmp.eq.s32.totalorder %v154_v54, %v823_v5 }
  0xbf   :  { %551 = vmatprep.mubr.msk.f32.mxu0 %vm252_vm8, %v212_v55  ;;  %v540_v61 = vsel %vm157_vm11, 1.0, %v728_v4  ;;  %v541_v62 = vsel %vm158_vm12, 1.0, %v728_v4 }
  0xc0   :  { %324 = vmatmul.mubr.f32.vlgmr.msra.gmra.mrb[0].mxu0 %v211_v53  ;;  %v169_v6 = vadd.f32 %v540_v61, %v147_v63  ;;  %v170_v7 = vadd.f32 %v541_v62, %v148_v0 }
  0xc2   :  { %v176_v60 = vpop.permute.xlu1 %175 }
  0xc3   :  { %vm179_vm13 = vcmp.eq.s32.totalorder %v176_v60, %v778_v3  ;;  %vm180_vm14 = vcmp.eq.s32.totalorder %v176_v60, %v823_v5 }
  0xc4   :  { %v544_v1 = vsel %vm179_vm13, 1.0, %v728_v4  ;;  %v545_v2 = vsel %vm180_vm14, 1.0, %v728_v4 }
  0xc5   :  { %v191_v9 = vadd.f32 %v544_v1, %v169_v6  ;;  %v192_v10 = vadd.f32 %v545_v2, %v170_v7 }
  0xc7   :  { %v198_v8 = vpop.permute.xlu1 %197 }
  0xc8   :  { %vm201_vm15 = vcmp.eq.s32.totalorder %v198_v8, %v778_v3  ;;  %vm202_vm0 = vcmp.eq.s32.totalorder %v198_v8, %v823_v5  ;;  %v362_v3 = vld [vmem:[%s951_s3] sm:$0xff]  ;;  %v363_v5 = vld [vmem:[%s951_s3 + $0x8] sm:$0xff] }
  0xc9   :  { %v548_v11 = vsel %vm201_vm15, 1.0, %v728_v4  ;;  %v549_v12 = vsel %vm202_vm0, 1.0, %v728_v4  ;;  %v620_v4 = vpack.c.bf16 %v363_v5, %v362_v3 }
  0xca   :  { %v213_v13 = vadd.f32 %v548_v11, %v191_v9  ;;  %v214_v14 = vadd.f32 %v549_v12, %v192_v10 }
  0xcb   :  { %621 = vmatprep.subr.bf16.mxu1 %v620_v4 }
  0xcc   :  { %552 = vmatprep.mubr.msk.f32.mxu0 %vm252_vm8, %v214_v14  ;;  %623 = vmatpush3.bf16.msra.mxu1 %v620_v4 }
  0xcd   :  { %329 = vmatmul.mubr.f32.gmra.mrb[2].mxu0 %v213_v13  ;;  %625 = vmatprep.subr.bf16.mxu1 %v624_v21 }
  0xd0   :  { %627 = vmatpush3.bf16.msra.mxu1 %v624_v21 }
 0x193   :  { %v325_v16 = vpop.f32.mrb[0].mxu0 }
 0x194   :  { %v326_v17 = vadd.f32 %v550_v15, %v325_v16  ;;  %v327_v18 = vpop.f32.mrb[1].mxu0 }
 0x196   :  { %338 = vrot.lane.b32.xlu0 %v326_v17, %s729_s15  ;;  %v334_v26 = vmax.f32 %v326_v17, 0.0 }
 0x19a   :  { %346 = vrot.lane.b32.xlu0 %v326_v17, %s730_s19 }
 0x19e   :  { %354 = vrot.lane.b32.xlu0 %v326_v17, %s731_s20 }
 0x1a0   :  { %v330_v22 = vpop.f32.mrb[2].mxu0 }
 0x1a1   :  { %v331_v23 = vadd.f32 %v550_v15, %v330_v22  ;;  %v332_v24 = vpop.f32.mrb[3].mxu0 }
 0x1a3   :  { %340 = vrot.lane.b32.xlu1 %v331_v23, %s729_s15  ;;  %v335_v33 = vmax.f32 %v331_v23, 0.0 }
 0x1a7   :  { %348 = vrot.lane.b32.xlu1 %v331_v23, %s730_s19 }
 0x1ab   :  { %356 = vrot.lane.b32.xlu1 %v331_v23, %s731_s20 }
 0x208   :  { %v339_v25 = vpop.permute.xlu0 %338 }
 0x209   :  { %v344_v28 = vmax.f32 %v334_v26, %v339_v25 }
 0x20c   :  { %v347_v27 = vpop.permute.xlu0 %346 }
 0x20d   :  { %v352_v29 = vmax.f32 %v344_v28, %v347_v27 }
 0x210   :  { %v355_v30 = vpop.permute.xlu0 %354 }
 0x211   :  { %v360_v31 = vmax.f32 %v352_v29, %v355_v30 }
 0x213   :  { %572 = vmatprep.mubr.msk.f32.mxu1 %vm373_vm1, %v360_v31 }
 0x215   :  { %v341_v32 = vpop.permute.xlu1 %340 }
 0x216   :  { %v345_v35 = vmax.f32 %v335_v33, %v341_v32 }
 0x219   :  { %v349_v34 = vpop.permute.xlu1 %348 }
 0x21a   :  { %v353_v36 = vmax.f32 %v345_v35, %v349_v34 }
 0x21d   :  { %v357_v37 = vpop.permute.xlu1 %356 }
 0x21e   :  { %v361_v38 = vmax.f32 %v353_v36, %v357_v37 }
 0x220   :  { %573 = vmatmul.mubr.msk.f32.vlgmr.msra.gmra.mrb[0].mxu1 %vm373_vm1, %v361_v38 }
 0x2f3   :  { %v574_v40 = vpop.f32.mrb[0].mxu1 }
 0x2f4   :  { %v452_v41 = vadd.f32 %v574_v40, %v553_v39  ;;  %v446_v42 = vpop.f32.mrb[1].mxu1 }
 0x2f5   :  { %v447_v43 = vadd.f32 %v553_v39, %v446_v42 }
 0x2f6   :  { %v456_v44 = vmax.f32 %v452_v41, 0.0  ;;  %v557_v46 = vmul.f32 -1.442695, %v452_v41 }
 0x2f7   :  { %v455_v45 = vmax.f32 %v447_v43, 0.0  ;;  %v556_v47 = vmul.f32 -1.442695, %v447_v43 }
 0x2f8   :  { %473 = vrot.lane.b32.xlu1 %v456_v44, %s731_s20  ;;  %660 = vpow2.f32 %v557_v46 }
 0x2f9   :  { %471 = vrot.lane.b32.xlu0 %v455_v45, %s731_s20  ;;  %662 = vpow2.f32 %v556_v47 }
 0x2fc   :  { %483 = vrot.lane.b32.xlu1 %v361_v38, %s731_s20 }
 0x2fd   :  { %481 = vrot.lane.b32.xlu0 %v360_v31, %s731_s20 }
 0x302   :  { %v661_v48 = vpop.eup %660 }
 0x303   :  { %v663_v49 = vpop.eup %662  ;;  %v464_v50 = vadd.f32 1.0, %v661_v48 }
 0x304   :  { %v463_v51 = vadd.f32 1.0, %v663_v49 }
 0x305   :  { %664 = vrcp.f32 %v464_v50 }
 0x306   :  { %666 = vrcp.f32 %v463_v51 }
 0x30f   :  { %v665_v52 = vpop.eup %664 }
 0x310   :  { %v667_v54 = vpop.eup %666  ;;  %v480_v56 = vsub.f32 1.0, %v665_v52 }
 0x311   :  { %v479_v58 = vsub.f32 1.0, %v667_v54 }
 0x36a   :  { %v474_v53 = vpop.permute.xlu1 %473 }
 0x36b   :  { %v472_v55 = vpop.permute.xlu0 %471  ;;  %v478_v59 = vmul.f32 %v665_v52, %v474_v53 }
 0x36c   :  { %v477_v62 = vmul.f32 %v667_v54, %v472_v55 }
 0x36e   :  { %v484_v57 = vpop.permute.xlu1 %483 }
 0x36f   :  { %v488_v60 = vmul.f32 %v484_v57, %v480_v56  ;;  %v482_v61 = vpop.permute.xlu0 %481 }
 0x370   :  { %v487_v63 = vmul.f32 %v482_v61, %v479_v58 }
 0x371   :  { %v490_v0 = vadd.f32 %v488_v60, %v478_v59 }
 0x372   :  { %v489_v1 = vadd.f32 %v487_v63, %v477_v62 }
 0x373   :  { %495 = vrot.lane.b32.xlu1 %v490_v0, %s729_s15 }
 0x374   :  { %493 = vrot.lane.b32.xlu0 %v489_v1, %s729_s15 }
 0x3e5   :  { %v496_v2 = vpop.permute.xlu1 %495 }
 0x3e6   :  { %500 = vst.msk [vmem:[#allocation5 + $0x8] sm:$0xff] %vm373_vm1, %v496_v2  ;;  %v494_v6 = vpop.permute.xlu0 %493 }
 0x3e7   :  { %499 = vst.msk [vmem:[#allocation5] sm:$0xff] %vm373_vm1, %v494_v6 }
 0x3e8   :  { %701 = shalt.err (!%p698_p12)
}
 0x3e9   :  { %s702_s26 = scalar_lea.hbm %s953_s5, 256 }
 0x3ea   :  { %p703_p13 = scmp.ne.s32.totalorder %s953_s5, %s702_s26  ;;  %p706_p0 = scmp.lt.u32.totalorder %s702_s26, %s953_s5 }
 0x3ec   :  { %p708_p1 = pnand %p706_p0, %p703_p13 }
 0x3ee   :  { %711 = shalt.err (!%p708_p1)
}
 0x3ef   :  { %512 = dma.vmem_to_hbm [thread:$0]  %s507_s22, 256, %s953_s5, [#allocation4], %s717_s28, %s717_s28, %s718_s29  }
 0x3f0   :  { %714 = dma.done.wait [#allocation4], 256  }
 0x3f1   :  { %715 = vsyncadd [#allocation4], 4294967040 }
 0x3f2   :  { %516 = vsyncpa [#allocation3], 1 }
 0x3f3   :  { %517 = vsyncpa [#allocation4], 1 }

</bundles_post_ra>
